<compile_context>
chip_gen: v6e
topology: v6e:2x2x1
jax: 0.10.0
libtpu: 0.0.40
codegen_flags: <defaults>
</compile_context>

<pallas_src>
import functools

import jax
import jax.numpy as jnp
from jax.experimental import pallas as pl
from jax.experimental.pallas import tpu as pltpu


# ----------------------------------------------------------------------------
# Deterministic parameter init (JAX re-implementation of he_orthogonal_init)
# ----------------------------------------------------------------------------
def _standardize(kernel: jnp.ndarray) -> jnp.ndarray:
    """Var(W) = 1, E[W] = 0 over axes [0, 1] for a 3D kernel (unbiased var)."""
    eps = 1e-6
    axis = (0, 1) if kernel.ndim == 3 else 1
    mean = jnp.mean(kernel, axis=axis, keepdims=True)
    var = jnp.var(kernel, axis=axis, keepdims=True, ddof=1)
    return (kernel - mean) / jnp.sqrt(var + eps)


def he_orthogonal_init(key, shape) -> jnp.ndarray:
    """Semi-orthogonal init (QR of a Gaussian), standardized, scaled by 1/sqrt(fan_in)."""
    num_spherical, num_radial, emb_size_interm = shape
    rows = num_spherical
    cols = num_radial * emb_size_interm
    g = jax.random.normal(key, (max(rows, cols), min(rows, cols)), dtype=jnp.float32)
    q, r = jnp.linalg.qr(g)
    q = q * jnp.sign(jnp.diagonal(r))[None, :]
    if rows < cols:
        q = q.T  # (rows, cols)
    w = q.reshape(num_spherical, num_radial, emb_size_interm)
    fan_in = num_spherical * num_radial  # tensor.shape[:-1].numel() for 3D weight
    w = _standardize(w) * (1.0 / fan_in) ** 0.5
    return w.astype(jnp.float32)


# ----------------------------------------------------------------------------
# Pallas kernel: per edge tile,
#   rbf_W1[:, e*S + s] = sum_r rbf_env[s, :, r] * weight[s, r, e]   (S small dots)
#   sph_T               = sph2d @ P   (exact 0/1 lane-permutation == transpose)
# Weight / permutation blocks are constant across the grid -> VMEM resident.
# ----------------------------------------------------------------------------
def _downproj_kernel(rbf_ref, sph_ref, w_ref, perm_ref, rbfw1_ref, spht_ref, *,
                     matmul_dtype):
    # rbf_ref  : (S, tile_e, R)      raw rbf_env tile (no wrapper transpose)
    # sph_ref  : (tile_e, S*Kmax)    free 2D view of sph tile
    # w_ref    : (S, R, E*S)         per-s scattered, output-permuted weight
    # perm_ref : (S*Kmax, Kmax*S)    0/1 permutation matrix
    # rbfw1_ref: (tile_e, E*S)       lane-dense; reshapes to (tile_e, E, S)
    # spht_ref : (tile_e, Kmax*S)    lane-dense; reshapes to (tile_e, Kmax, S)
    S = rbf_ref.shape[0]
    acc = jnp.zeros(rbfw1_ref.shape, jnp.float32)
    for s in range(S):  # S is small (4..7): fully unrolled static loop
        x = rbf_ref[s]   # (tile_e, R)
        w = w_ref[s]     # (R, E*S)
        if matmul_dtype is not None:
            x = x.astype(matmul_dtype)
            w = w.astype(matmul_dtype)
        acc = acc + jnp.dot(x, w, preferred_element_type=jnp.float32)
    rbfw1_ref[...] = acc.astype(rbfw1_ref.dtype)

    # Exact permutation (multiplies by 1.0/0.0 only) == torch.transpose(sph, 1, 2).
    spht_ref[...] = jnp.dot(
        sph_ref[...], perm_ref[...], preferred_element_type=jnp.float32
    ).astype(spht_ref.dtype)


def _vmem_capacity_bytes(default_bytes: int = 64 << 20) -> int:
    """Physical VMEM per core; conservative 64 MiB fallback (v7x-safe)."""
    try:
        info = pltpu.get_tpu_info()
        cap = getattr(info, "vmem_capacity_bytes", None)
        if cap:
            return int(cap)
    except Exception:
        pass
    return default_bytes


def efficient_interaction_down_projection(tbf, weight, *, tile_edges=8192,
                                          matmul_dtype=None, out_dtype=None):
    """
    tbf = (rbf_env, sph)
      rbf_env: (num_spherical, nEdges, num_radial)
      sph    : (nEdges, num_spherical, Kmax)
    Returns:
      rbf_W1 : (nEdges, emb_size_interm, num_spherical)
      sph    : (nEdges, Kmax, num_spherical)

    matmul_dtype: optional (e.g. jnp.bfloat16) low-precision input cast for the
      main dots (f32 accumulation kept).  Useful on v5e where the padded MXU
      work would otherwise be near the compute/memory crossover.  Default None
      keeps exact f32 semantics.
    out_dtype: optional dtype for rbf_W1 (dominant HBM stream); default keeps
      the input dtype.  bf16 here is a deliberate precision tradeoff.
    """
    rbf_env, sph = tbf
    S, n_edges, R = rbf_env.shape
    E = weight.shape[-1]
    kmax = sph.shape[-1]
    itemsize = jnp.dtype(rbf_env.dtype).itemsize
    out_dtype = rbf_env.dtype if out_dtype is None else out_dtype

    # ---- Pack the (tiny) weight once with the output permute folded into the
    # column order:  w3[s, r, e*S + t] = weight[s, r, e] * (t == s)
    eye = jnp.eye(S, dtype=weight.dtype)
    w3 = jnp.einsum("sre,st->sret", weight, eye).reshape(S, R, E * S)

    # ---- sph: metadata-only 2D view + 0/1 permutation matrix folding the
    # torch.transpose(sph, 1, 2) into the kernel (column k*S + s <- s*Kmax + k).
    sph2d = sph.reshape(n_edges, S * kmax)
    src = jnp.arange(S * kmax)
    dst = (src % kmax) * S + (src // kmax)
    perm = jax.nn.one_hot(dst, kmax * S, dtype=sph.dtype)  # (S*Kmax, Kmax*S)

    # ---- Tile sizing under the per-generation VMEM budget (v7x: 64 MiB phys).
    vmem_budget = min((_vmem_capacity_bytes() * 3) // 4, 96 << 20)
    # double-buffered streaming operands per edge + resident (double-buffered) constants
    per_edge_bytes = 2 * itemsize * (S * R + S * kmax + E * S + kmax * S)
    fixed_bytes = 2 * itemsize * (S * R * E * S + (S * kmax) * (kmax * S))
    max_tile = (vmem_budget - fixed_bytes - (4 << 20)) // per_edge_bytes
    max_tile = max(8, (max_tile // 8) * 8)
    tile_e = min(tile_edges, n_edges, max_tile)
    if tile_e < n_edges:
        tile_e = max(8, (tile_e // 8) * 8)  # sublane-dim divisible by 8
    grid_e = pl.cdiv(n_edges, tile_e)

    vmem_limit = int(min(vmem_budget,
                         max(32 << 20, fixed_bytes + per_edge_bytes * tile_e + (8 << 20))))

    # True algorithmic work (no block-scatter zero FLOPs); real HBM traffic.
    cost = pl.CostEstimate(
        flops=int(2 * n_edges * S * R * E),
        transcendentals=0,
        bytes_accessed=int(itemsize * (S * n_edges * R          # rbf_env
                                       + S * R * E * S          # packed weight
                                       + n_edges * S * kmax     # sph in
                                       + (S * kmax) * (kmax * S)  # perm
                                       + n_edges * E * S        # rbf_W1 out
                                       + n_edges * kmax * S)),  # sph out
    )

    kernel = functools.partial(_downproj_kernel, matmul_dtype=matmul_dtype)

    out2d, spht2d = pl.pallas_call(
        kernel,
        out_shape=(jax.ShapeDtypeStruct((n_edges, E * S), out_dtype),
                   jax.ShapeDtypeStruct((n_edges, kmax * S), sph.dtype)),
        grid_spec=pltpu.PrefetchScalarGridSpec(
            num_scalar_prefetch=0,
            grid=(grid_e,),
            in_specs=[
                # rbf_env tiled along edges, full S and R (no wrapper repack)
                pl.BlockSpec((S, tile_e, R), lambda i: (0, i, 0)),
                # sph (2D view) tiled along edges
                pl.BlockSpec((tile_e, S * kmax), lambda i: (i, 0)),
                # packed weight, constant block index -> stays VMEM resident
                pl.BlockSpec((S, R, E * S), lambda i: (0, 0, 0)),
                # permutation matrix, constant block index -> VMEM resident
                pl.BlockSpec((S * kmax, kmax * S), lambda i: (0, 0)),
            ],
            out_specs=[
                pl.BlockSpec((tile_e, E * S), lambda i: (i, 0)),
                pl.BlockSpec((tile_e, kmax * S), lambda i: (i, 0)),
            ],
        ),
        compiler_params=pltpu.CompilerParams(
            dimension_semantics=("parallel",),   # megacore / 2-TC sharding over edge tiles
            vmem_limit_bytes=vmem_limit,
        ),
        cost_estimate=cost,
    )(rbf_env, sph2d, w3, perm)

    # Free reshapes: column c = e*S + s  ->  (nEdges, E, S)  == permute(1, 2, 0);
    #                column c = k*S + s  ->  (nEdges, Kmax, S) == transpose(sph, 1, 2).
    rbf_w1 = out2d.reshape(n_edges, E, S)
    sph_out = spht2d.reshape(n_edges, kmax, S)
    return rbf_w1, sph_out


if __name__ == "__main__":
    # Small, deterministic example shapes (multiple edge tiles to exercise the grid).
    num_spherical = 4
    num_radial = 8
    emb_size_interm = 16
    n_edges = 256
    kmax = 8
    tile_edges = 128

    key = jax.random.PRNGKey(0)
    k_w, k_rbf, k_sph = jax.random.split(key, 3)

    weight = he_orthogonal_init(k_w, (num_spherical, num_radial, emb_size_interm))
    rbf_env = jax.random.normal(k_rbf, (num_spherical, n_edges, num_radial), jnp.float32)
    sph = jax.random.normal(k_sph, (n_edges, num_spherical, kmax), jnp.float32)

    fwd = jax.jit(
        functools.partial(efficient_interaction_down_projection, tile_edges=tile_edges)
    )
    rbf_w1, sph_out = fwd((rbf_env, sph), weight)
    jax.block_until_ready((rbf_w1, sph_out))

    # Reference check against plain JAX (same semantics as the torch module).
    ref = jnp.transpose(jnp.einsum("ser,sri->sei", rbf_env, weight), (1, 2, 0))
    assert rbf_w1.shape == (n_edges, emb_size_interm, num_spherical), rbf_w1.shape
    assert sph_out.shape == (n_edges, kmax, num_spherical), sph_out.shape
    assert jnp.allclose(rbf_w1, ref, atol=5e-5, rtol=5e-5), float(
        jnp.max(jnp.abs(rbf_w1 - ref))
    )
    assert jnp.allclose(sph_out, jnp.transpose(sph, (0, 2, 1)))

    print("KERNEL_OK")
</pallas_src>

<mosaic_0001>
module attributes {stable_mosaic.version = 11 : i64} {
  func.func @_downproj_kernel(%arg0: i32, %arg1: memref<4x128x8xf32, #tpu.memory_space<vmem>>, %arg2: memref<128x32xf32, #tpu.memory_space<vmem>>, %arg3: memref<4x8x64xf32, #tpu.memory_space<vmem>>, %arg4: memref<32x32xf32, #tpu.memory_space<vmem>>, %arg5: memref<128x64xf32, #tpu.memory_space<vmem>>, %arg6: memref<128x32xf32, #tpu.memory_space<vmem>>) attributes {dimension_semantics = [#tpu.dimension_semantics<parallel>], iteration_bounds = array<i64: 2>, scalar_prefetch = 0 : i64, scratch_operands = 0 : i64, tpu.core_type = #tpu.core_type<tc>, window_params = [{transform_indices = @transform_0, window_bounds = array<i64: 4, 128, 8>}, {transform_indices = @transform_1, window_bounds = array<i64: 128, 32>}, {pipeline_mode = #tpu.pipeline_mode<synchronous>, transform_indices = @transform_2, window_bounds = array<i64: 4, 8, 64>}, {pipeline_mode = #tpu.pipeline_mode<synchronous>, transform_indices = @transform_3, window_bounds = array<i64: 32, 32>}, {transform_indices = @transform_4, window_bounds = array<i64: 128, 64>}, {transform_indices = @transform_5, window_bounds = array<i64: 128, 32>}]} {
    %cst = arith.constant 0.000000e+00 : f32
    %0 = vector.broadcast %cst : f32 to vector<128x64xf32>
    %c0 = arith.constant 0 : index
    %c0_0 = arith.constant 0 : index
    %c0_1 = arith.constant 0 : index
    %1 = vector.load %arg1[%c0, %c0_0, %c0_1] : memref<4x128x8xf32, #tpu.memory_space<vmem>>, vector<1x128x8xf32>
    %2 = vector.shape_cast %1 : vector<1x128x8xf32> to vector<128x8xf32>
    %c0_2 = arith.constant 0 : index
    %c0_3 = arith.constant 0 : index
    %c0_4 = arith.constant 0 : index
    %3 = vector.load %arg3[%c0_2, %c0_3, %c0_4] : memref<4x8x64xf32, #tpu.memory_space<vmem>>, vector<1x8x64xf32>
    %4 = vector.shape_cast %3 : vector<1x8x64xf32> to vector<8x64xf32>
    %cst_5 = arith.constant dense<0.000000e+00> : vector<128x64xf32>
    %5 = tpu.matmul %2, %4, %cst_5 {dimension_numbers = #tpu.dot_dimension_numbers<[1], [0], [0], [1], [0, 0, 1, 1], [], []>} : vector<128x8xf32>, vector<8x64xf32>, vector<128x64xf32> -> vector<128x64xf32>
    %6 = arith.addf %0, %5 : vector<128x64xf32>
    %c1 = arith.constant 1 : index
    %c0_6 = arith.constant 0 : index
    %c0_7 = arith.constant 0 : index
    %7 = vector.load %arg1[%c1, %c0_6, %c0_7] : memref<4x128x8xf32, #tpu.memory_space<vmem>>, vector<1x128x8xf32>
    %8 = vector.shape_cast %7 : vector<1x128x8xf32> to vector<128x8xf32>
    %c1_8 = arith.constant 1 : index
    %c0_9 = arith.constant 0 : index
    %c0_10 = arith.constant 0 : index
    %9 = vector.load %arg3[%c1_8, %c0_9, %c0_10] : memref<4x8x64xf32, #tpu.memory_space<vmem>>, vector<1x8x64xf32>
    %10 = vector.shape_cast %9 : vector<1x8x64xf32> to vector<8x64xf32>
    %cst_11 = arith.constant dense<0.000000e+00> : vector<128x64xf32>
    %11 = tpu.matmul %8, %10, %cst_11 {dimension_numbers = #tpu.dot_dimension_numbers<[1], [0], [0], [1], [0, 0, 1, 1], [], []>} : vector<128x8xf32>, vector<8x64xf32>, vector<128x64xf32> -> vector<128x64xf32>
    %12 = arith.addf %6, %11 : vector<128x64xf32>
    %c2 = arith.constant 2 : index
    %c0_12 = arith.constant 0 : index
    %c0_13 = arith.constant 0 : index
    %13 = vector.load %arg1[%c2, %c0_12, %c0_13] : memref<4x128x8xf32, #tpu.memory_space<vmem>>, vector<1x128x8xf32>
    %14 = vector.shape_cast %13 : vector<1x128x8xf32> to vector<128x8xf32>
    %c2_14 = arith.constant 2 : index
    %c0_15 = arith.constant 0 : index
    %c0_16 = arith.constant 0 : index
    %15 = vector.load %arg3[%c2_14, %c0_15, %c0_16] : memref<4x8x64xf32, #tpu.memory_space<vmem>>, vector<1x8x64xf32>
    %16 = vector.shape_cast %15 : vector<1x8x64xf32> to vector<8x64xf32>
    %cst_17 = arith.constant dense<0.000000e+00> : vector<128x64xf32>
    %17 = tpu.matmul %14, %16, %cst_17 {dimension_numbers = #tpu.dot_dimension_numbers<[1], [0], [0], [1], [0, 0, 1, 1], [], []>} : vector<128x8xf32>, vector<8x64xf32>, vector<128x64xf32> -> vector<128x64xf32>
    %18 = arith.addf %12, %17 : vector<128x64xf32>
    %c3 = arith.constant 3 : index
    %c0_18 = arith.constant 0 : index
    %c0_19 = arith.constant 0 : index
    %19 = vector.load %arg1[%c3, %c0_18, %c0_19] : memref<4x128x8xf32, #tpu.memory_space<vmem>>, vector<1x128x8xf32>
    %20 = vector.shape_cast %19 : vector<1x128x8xf32> to vector<128x8xf32>
    %c3_20 = arith.constant 3 : index
    %c0_21 = arith.constant 0 : index
    %c0_22 = arith.constant 0 : index
    %21 = vector.load %arg3[%c3_20, %c0_21, %c0_22] : memref<4x8x64xf32, #tpu.memory_space<vmem>>, vector<1x8x64xf32>
    %22 = vector.shape_cast %21 : vector<1x8x64xf32> to vector<8x64xf32>
    %cst_23 = arith.constant dense<0.000000e+00> : vector<128x64xf32>
    %23 = tpu.matmul %20, %22, %cst_23 {dimension_numbers = #tpu.dot_dimension_numbers<[1], [0], [0], [1], [0, 0, 1, 1], [], []>} : vector<128x8xf32>, vector<8x64xf32>, vector<128x64xf32> -> vector<128x64xf32>
    %24 = arith.addf %18, %23 : vector<128x64xf32>
    %c0_24 = arith.constant 0 : index
    %c0_25 = arith.constant 0 : index
    %25 = vector.load %arg5[%c0_24, %c0_25] : memref<128x64xf32, #tpu.memory_space<vmem>>, vector<128x64xf32>
    tpu.vector_store %arg5[%c0_24, %c0_25], %24 {strides = array<i32>} : memref<128x64xf32, #tpu.memory_space<vmem>>, vector<128x64xf32>,
    %c0_26 = arith.constant 0 : index
    %c0_27 = arith.constant 0 : index
    %26 = vector.load %arg2[%c0_26, %c0_27] : memref<128x32xf32, #tpu.memory_space<vmem>>, vector<128x32xf32>
    %c0_28 = arith.constant 0 : index
    %c0_29 = arith.constant 0 : index
    %27 = vector.load %arg4[%c0_28, %c0_29] : memref<32x32xf32, #tpu.memory_space<vmem>>, vector<32x32xf32>
    %cst_30 = arith.constant dense<0.000000e+00> : vector<128x32xf32>
    %28 = tpu.matmul %26, %27, %cst_30 {dimension_numbers = #tpu.dot_dimension_numbers<[1], [0], [0], [1], [0, 0, 1, 1], [], []>} : vector<128x32xf32>, vector<32x32xf32>, vector<128x32xf32> -> vector<128x32xf32>
    %c0_31 = arith.constant 0 : index
    %c0_32 = arith.constant 0 : index
    %29 = vector.load %arg6[%c0_31, %c0_32] : memref<128x32xf32, #tpu.memory_space<vmem>>, vector<128x32xf32>
    tpu.vector_store %arg6[%c0_31, %c0_32], %28 {strides = array<i32>} : memref<128x32xf32, #tpu.memory_space<vmem>>, vector<128x32xf32>,
    return
  }
  func.func @transform_0(%arg0: i32) -> (i32, i32, i32) {
    %c0_i32 = arith.constant 0 : i32
    %c0_i32_0 = arith.constant 0 : i32
    %c0_i32_1 = arith.constant 0 : i32
    return %c0_i32, %arg0, %c0_i32_0 : i32, i32, i32
  }
  func.func @transform_1(%arg0: i32) -> (i32, i32) {
    %c0_i32 = arith.constant 0 : i32
    %c0_i32_0 = arith.constant 0 : i32
    return %arg0, %c0_i32 : i32, i32
  }
  func.func @transform_2(%arg0: i32) -> (i32, i32, i32) {
    %c0_i32 = arith.constant 0 : i32
    %c0_i32_0 = arith.constant 0 : i32
    %c0_i32_1 = arith.constant 0 : i32
    %c0_i32_2 = arith.constant 0 : i32
    return %c0_i32, %c0_i32_0, %c0_i32_1 : i32, i32, i32
  }
  func.func @transform_3(%arg0: i32) -> (i32, i32) {
    %c0_i32 = arith.constant 0 : i32
    %c0_i32_0 = arith.constant 0 : i32
    %c0_i32_1 = arith.constant 0 : i32
    return %c0_i32, %c0_i32_0 : i32, i32
  }
  func.func @transform_4(%arg0: i32) -> (i32, i32) {
    %c0_i32 = arith.constant 0 : i32
    %c0_i32_0 = arith.constant 0 : i32
    return %arg0, %c0_i32 : i32, i32
  }
  func.func @transform_5(%arg0: i32) -> (i32, i32) {
    %c0_i32 = arith.constant 0 : i32
    %c0_i32_0 = arith.constant 0 : i32
    return %arg0, %c0_i32 : i32, i32
  }
}

</mosaic_0001>

<bundles_post_ra>
// kernel: efficient_interaction_down_projection.1
= control target key start
LH: loop header
LB: loop body
LE: loop exit
PB: predicated region body
PF: predicated region fallthrough
CT: control target
= control target key end

     0   :  { %s2238_s18 = smov 0   ;;  %s2240_s19 = smov 0   ;;  %s2767_s0 = inlined_call_operand.vmem [shape: f32[4,256,8], index: 0, kind: input, shape index: {}]   ;;  %s2768_s1 = inlined_call_operand.vmem [shape: f32[256,32], index: 1, kind: input, shape index: {}]   ;;  %s2769_s2 = inlined_call_operand.vmem [shape: f32[4,8,64], index: 2, kind: input, shape index: {}]   ;;  %s2770_s3 = inlined_call_operand.vmem [shape: f32[32,32], index: 3, kind: input, shape index: {}]   ;;  %s2771_s4 = inlined_call_operand.vmem [shape: f32[256,64], index: 4, kind: output, shape index: {0}]   ;;  %s2772_s5 = inlined_call_operand.vmem [shape: f32[256,32], index: 5, kind: output, shape index: {1}]  }
   0x1   :  { %s2242_s20 = smov 0  }
   0x2 LB: > { %s1785_s21 = sadd.s32 4294967295, %s2206_s20   ;;  %s2255_s22 = sadd.s32 1, %s2206_s20   ;;  %s2206_s20 = sphi %s2242_s20, %s2775_s20   ;;  %s2202_s19 = sphi %s2240_s19, %s2774_s19   ;;  %s2198_s18 = sphi %s2238_s18, %s2773_s18  }
   0x3   : > { %s20_s23 = ssub.s32 %s2206_s20, %s2255_s22  ;;  %s23_s24 = sadd.s32 1, %s2202_s19 }
   0x4   : > { %p21_p0 = scmp.eq.s32.totalorder %s20_s23, 0  ;;  %p30_p1 = scmp.ne.s32.totalorder %s2202_s19, %s2198_s18 }
   0x5   : > { %p31_p2 = scmp.eq.s32.totalorder %s2206_s20, 0  ;;  %p1788_p4 = scmp.ge.s32.totalorder %s2206_s20, 2 }
   0x6   : > { %s2264_s25 = scalar_select %p21_p0, %s2202_s19, %s23_s24  }
   0x7   : > { %p32_p3 = por %p31_p2, %p30_p1  ;;  %182 = sbr.rel (%p1788_p4) target bundleno = 48 (0x30), region = 24 }
   0xc   : > { %185 = sbr.rel (!%p32_p3) target bundleno = 48 (0x30), region = 28  ;;  %s187_s26 = sand.u32 (%p32_p3), 1, %s2202_s19  }
   0xd   : > { %s1933_s27 = sshll.u32 (%p32_p3), %s2206_s20, 7  ;;  %s1789_s28 = sshll.u32 (%p32_p3), %s187_s26, 9 }
   0xe   : > { %s2272_s6 = scalar_lea.vmem (%p32_p3), %s2767_s0, %s1933_s27  ;;  %s2277_s7 = scalar_lea.vmem (%p32_p3), [#allocation2], %s1789_s28 }
   0xf   : > { %v347_v0 = vld [vmem:[%s2272_s6] sm:$0xff] (%p32_p3)  ;;  %v349_v1 = vld [vmem:[%s2272_s6 + $0x8] sm:$0xff] (%p32_p3)  ;;  %v351_v2 = vld [vmem:[%s2272_s6 + $0x10] sm:$0xff] (%p32_p3) }
  0x10   : > { %348 = vst [vmem:[%s2277_s7] sm:$0xff] (%p32_p3), %v347_v0  ;;  %350 = vst [vmem:[%s2277_s7 + $0x8] sm:$0xff] (%p32_p3), %v349_v1  ;;  %v353_v3 = vld [vmem:[%s2272_s6 + $0x18] sm:$0xff] (%p32_p3)  ;;  %v355_v4 = vld [vmem:[%s2272_s6 + $0x20] sm:$0xff] (%p32_p3) }
  0x11   : > { %352 = vst [vmem:[%s2277_s7 + $0x10] sm:$0xff] %v351_v2  ;;  %v357_v5 = vld [vmem:[%s2272_s6 + $0x28] sm:$0xff]  ;;  %354 = vst [vmem:[%s2277_s7 + $0x18] sm:$0xff] %v353_v3  ;;  %v359_v6 = vld [vmem:[%s2272_s6 + $0x30] sm:$0xff] }
  0x12   : > { %356 = vst [vmem:[%s2277_s7 + $0x20] sm:$0xff] %v355_v4  ;;  %358 = vst [vmem:[%s2277_s7 + $0x28] sm:$0xff] %v357_v5  ;;  %v361_v7 = vld [vmem:[%s2272_s6 + $0x38] sm:$0xff]  ;;  %v363_v8 = vld [vmem:[%s2272_s6 + $0x40] sm:$0xff] }
  0x13   : > { %360 = vst [vmem:[%s2277_s7 + $0x30] sm:$0xff] %v359_v6  ;;  %362 = vst [vmem:[%s2277_s7 + $0x38] sm:$0xff] %v361_v7  ;;  %v365_v9 = vld [vmem:[%s2272_s6 + $0x48] sm:$0xff]  ;;  %v367_v10 = vld [vmem:[%s2272_s6 + $0x50] sm:$0xff] }
  0x14   : > { %364 = vst [vmem:[%s2277_s7 + $0x40] sm:$0xff] %v363_v8  ;;  %v369_v11 = vld [vmem:[%s2272_s6 + $0x58] sm:$0xff]  ;;  %366 = vst [vmem:[%s2277_s7 + $0x48] sm:$0xff] %v365_v9  ;;  %v371_v12 = vld [vmem:[%s2272_s6 + $0x60] sm:$0xff] }
  0x15   : > { %368 = vst [vmem:[%s2277_s7 + $0x50] sm:$0xff] %v367_v10  ;;  %370 = vst [vmem:[%s2277_s7 + $0x58] sm:$0xff] %v369_v11  ;;  %v373_v13 = vld [vmem:[%s2272_s6 + $0x68] sm:$0xff]  ;;  %v375_v14 = vld [vmem:[%s2272_s6 + $0x70] sm:$0xff] }
  0x16   : > { %372 = vst [vmem:[%s2277_s7 + $0x60] sm:$0xff] %v371_v12  ;;  %374 = vst [vmem:[%s2277_s7 + $0x68] sm:$0xff] %v373_v13  ;;  %v377_v15 = vld [vmem:[%s2272_s6 + $0x78] sm:$0xff]  ;;  %v379_v16 = vld [vmem:[%s2272_s6 + $0x100] sm:$0xff] }
  0x17   : > { %376 = vst [vmem:[%s2277_s7 + $0x70] sm:$0xff] %v375_v14  ;;  %v381_v17 = vld [vmem:[%s2272_s6 + $0x108] sm:$0xff]  ;;  %378 = vst [vmem:[%s2277_s7 + $0x78] sm:$0xff] %v377_v15  ;;  %v383_v18 = vld [vmem:[%s2272_s6 + $0x110] sm:$0xff] }
  0x18   : > { %380 = vst [vmem:[%s2277_s7 + $0x80] sm:$0xff] %v379_v16  ;;  %382 = vst [vmem:[%s2277_s7 + $0x88] sm:$0xff] %v381_v17  ;;  %v385_v19 = vld [vmem:[%s2272_s6 + $0x118] sm:$0xff]  ;;  %v387_v20 = vld [vmem:[%s2272_s6 + $0x120] sm:$0xff] }
  0x19   : > { %384 = vst [vmem:[%s2277_s7 + $0x90] sm:$0xff] %v383_v18  ;;  %386 = vst [vmem:[%s2277_s7 + $0x98] sm:$0xff] %v385_v19  ;;  %v389_v21 = vld [vmem:[%s2272_s6 + $0x128] sm:$0xff]  ;;  %v391_v22 = vld [vmem:[%s2272_s6 + $0x130] sm:$0xff] }
  0x1a   : > { %388 = vst [vmem:[%s2277_s7 + $0xa0] sm:$0xff] %v387_v20  ;;  %v393_v23 = vld [vmem:[%s2272_s6 + $0x138] sm:$0xff]  ;;  %390 = vst [vmem:[%s2277_s7 + $0xa8] sm:$0xff] %v389_v21  ;;  %v395_v24 = vld [vmem:[%s2272_s6 + $0x140] sm:$0xff] }
  0x1b   : > { %392 = vst [vmem:[%s2277_s7 + $0xb0] sm:$0xff] %v391_v22  ;;  %394 = vst [vmem:[%s2277_s7 + $0xb8] sm:$0xff] %v393_v23  ;;  %v397_v25 = vld [vmem:[%s2272_s6 + $0x148] sm:$0xff]  ;;  %v399_v26 = vld [vmem:[%s2272_s6 + $0x150] sm:$0xff] }
  0x1c   : > { %396 = vst [vmem:[%s2277_s7 + $0xc0] sm:$0xff] %v395_v24  ;;  %398 = vst [vmem:[%s2277_s7 + $0xc8] sm:$0xff] %v397_v25  ;;  %v401_v27 = vld [vmem:[%s2272_s6 + $0x158] sm:$0xff]  ;;  %v403_v28 = vld [vmem:[%s2272_s6 + $0x160] sm:$0xff] }
  0x1d   : > { %400 = vst [vmem:[%s2277_s7 + $0xd0] sm:$0xff] %v399_v26  ;;  %v405_v29 = vld [vmem:[%s2272_s6 + $0x168] sm:$0xff]  ;;  %402 = vst [vmem:[%s2277_s7 + $0xd8] sm:$0xff] %v401_v27  ;;  %v407_v30 = vld [vmem:[%s2272_s6 + $0x170] sm:$0xff] }
  0x1e   : > { %404 = vst [vmem:[%s2277_s7 + $0xe0] sm:$0xff] %v403_v28  ;;  %406 = vst [vmem:[%s2277_s7 + $0xe8] sm:$0xff] %v405_v29  ;;  %v409_v31 = vld [vmem:[%s2272_s6 + $0x178] sm:$0xff]  ;;  %v411_v32 = vld [vmem:[%s2272_s6 + $0x200] sm:$0xff] }
  0x1f   : > { %408 = vst [vmem:[%s2277_s7 + $0xf0] sm:$0xff] %v407_v30  ;;  %410 = vst [vmem:[%s2277_s7 + $0xf8] sm:$0xff] %v409_v31  ;;  %v413_v33 = vld [vmem:[%s2272_s6 + $0x208] sm:$0xff]  ;;  %v415_v34 = vld [vmem:[%s2272_s6 + $0x210] sm:$0xff] }
  0x20   : > { %412 = vst [vmem:[%s2277_s7 + $0x100] sm:$0xff] %v411_v32  ;;  %v417_v35 = vld [vmem:[%s2272_s6 + $0x218] sm:$0xff]  ;;  %414 = vst [vmem:[%s2277_s7 + $0x108] sm:$0xff] %v413_v33  ;;  %v419_v36 = vld [vmem:[%s2272_s6 + $0x220] sm:$0xff] }
  0x21   : > { %416 = vst [vmem:[%s2277_s7 + $0x110] sm:$0xff] %v415_v34  ;;  %418 = vst [vmem:[%s2277_s7 + $0x118] sm:$0xff] %v417_v35  ;;  %v421_v37 = vld [vmem:[%s2272_s6 + $0x228] sm:$0xff]  ;;  %v423_v38 = vld [vmem:[%s2272_s6 + $0x230] sm:$0xff] }
  0x22   : > { %420 = vst [vmem:[%s2277_s7 + $0x120] sm:$0xff] %v419_v36  ;;  %422 = vst [vmem:[%s2277_s7 + $0x128] sm:$0xff] %v421_v37  ;;  %v425_v39 = vld [vmem:[%s2272_s6 + $0x238] sm:$0xff]  ;;  %v427_v40 = vld [vmem:[%s2272_s6 + $0x240] sm:$0xff] }
  0x23   : > { %424 = vst [vmem:[%s2277_s7 + $0x130] sm:$0xff] %v423_v38  ;;  %v429_v41 = vld [vmem:[%s2272_s6 + $0x248] sm:$0xff]  ;;  %426 = vst [vmem:[%s2277_s7 + $0x138] sm:$0xff] %v425_v39  ;;  %v431_v42 = vld [vmem:[%s2272_s6 + $0x250] sm:$0xff] }
  0x24   : > { %428 = vst [vmem:[%s2277_s7 + $0x140] sm:$0xff] %v427_v40  ;;  %430 = vst [vmem:[%s2277_s7 + $0x148] sm:$0xff] %v429_v41  ;;  %v433_v43 = vld [vmem:[%s2272_s6 + $0x258] sm:$0xff]  ;;  %v435_v44 = vld [vmem:[%s2272_s6 + $0x260] sm:$0xff] }
  0x25   : > { %432 = vst [vmem:[%s2277_s7 + $0x150] sm:$0xff] %v431_v42  ;;  %434 = vst [vmem:[%s2277_s7 + $0x158] sm:$0xff] %v433_v43  ;;  %v437_v45 = vld [vmem:[%s2272_s6 + $0x268] sm:$0xff]  ;;  %v439_v46 = vld [vmem:[%s2272_s6 + $0x270] sm:$0xff] }
  0x26   : > { %436 = vst [vmem:[%s2277_s7 + $0x160] sm:$0xff] %v435_v44  ;;  %v441_v47 = vld [vmem:[%s2272_s6 + $0x278] sm:$0xff]  ;;  %438 = vst [vmem:[%s2277_s7 + $0x168] sm:$0xff] %v437_v45  ;;  %v443_v48 = vld [vmem:[%s2272_s6 + $0x300] sm:$0xff] }
  0x27   : > { %440 = vst [vmem:[%s2277_s7 + $0x170] sm:$0xff] %v439_v46  ;;  %442 = vst [vmem:[%s2277_s7 + $0x178] sm:$0xff] %v441_v47  ;;  %v445_v49 = vld [vmem:[%s2272_s6 + $0x308] sm:$0xff]  ;;  %v447_v50 = vld [vmem:[%s2272_s6 + $0x310] sm:$0xff] }
  0x28   : > { %444 = vst [vmem:[%s2277_s7 + $0x180] sm:$0xff] %v443_v48  ;;  %446 = vst [vmem:[%s2277_s7 + $0x188] sm:$0xff] %v445_v49  ;;  %v449_v51 = vld [vmem:[%s2272_s6 + $0x318] sm:$0xff]  ;;  %v451_v52 = vld [vmem:[%s2272_s6 + $0x320] sm:$0xff] }
  0x29   : > { %448 = vst [vmem:[%s2277_s7 + $0x190] sm:$0xff] %v447_v50  ;;  %v453_v53 = vld [vmem:[%s2272_s6 + $0x328] sm:$0xff]  ;;  %450 = vst [vmem:[%s2277_s7 + $0x198] sm:$0xff] %v449_v51  ;;  %v455_v54 = vld [vmem:[%s2272_s6 + $0x330] sm:$0xff] }
  0x2a   : > { %452 = vst [vmem:[%s2277_s7 + $0x1a0] sm:$0xff] %v451_v52  ;;  %454 = vst [vmem:[%s2277_s7 + $0x1a8] sm:$0xff] %v453_v53  ;;  %v457_v55 = vld [vmem:[%s2272_s6 + $0x338] sm:$0xff]  ;;  %v459_v56 = vld [vmem:[%s2272_s6 + $0x340] sm:$0xff] }
  0x2b   : > { %456 = vst [vmem:[%s2277_s7 + $0x1b0] sm:$0xff] %v455_v54  ;;  %458 = vst [vmem:[%s2277_s7 + $0x1b8] sm:$0xff] %v457_v55  ;;  %v461_v57 = vld [vmem:[%s2272_s6 + $0x348] sm:$0xff]  ;;  %v463_v58 = vld [vmem:[%s2272_s6 + $0x350] sm:$0xff] }
  0x2c   : > { %460 = vst [vmem:[%s2277_s7 + $0x1c0] sm:$0xff] %v459_v56  ;;  %v465_v59 = vld [vmem:[%s2272_s6 + $0x358] sm:$0xff]  ;;  %462 = vst [vmem:[%s2277_s7 + $0x1c8] sm:$0xff] %v461_v57  ;;  %v467_v60 = vld [vmem:[%s2272_s6 + $0x360] sm:$0xff] }
  0x2d   : > { %464 = vst [vmem:[%s2277_s7 + $0x1d0] sm:$0xff] %v463_v58  ;;  %466 = vst [vmem:[%s2277_s7 + $0x1d8] sm:$0xff] %v465_v59  ;;  %v469_v61 = vld [vmem:[%s2272_s6 + $0x368] sm:$0xff]  ;;  %v471_v62 = vld [vmem:[%s2272_s6 + $0x370] sm:$0xff] }
  0x2e   : > { %468 = vst [vmem:[%s2277_s7 + $0x1e0] sm:$0xff] %v467_v60  ;;  %470 = vst [vmem:[%s2277_s7 + $0x1e8] sm:$0xff] %v469_v61  ;;  %v473_v63 = vld [vmem:[%s2272_s6 + $0x378] sm:$0xff] }
  0x2f   : > { %472 = vst [vmem:[%s2277_s7 + $0x1f0] sm:$0xff] %v471_v62  ;;  %474 = vst [vmem:[%s2277_s7 + $0x1f8] sm:$0xff] %v473_v63 }
  0x30 PF: > { %p1792_p5 = scmp.ge.s32.totalorder %s2206_s20, 1  ;;  %p488_p6 = scmp.lt.s32.totalorder %s2206_s20, 3 }
  0x32   : > { %p489_p7 = pnand %p1792_p5, %p488_p6 }
  0x33   : > { %s495_s10 = sand.u32 (!%p489_p7), 1, %s2198_s18   ;;  %s1794_s7 = sshll.u32 (!%p489_p7), %s1785_s21, 4 }
  0x34   : > { %492 = sbr.rel (%p489_p7) target bundleno = 336 (0x150), region = 70  ;;  %s1793_s15 = sshll.u32 (!%p489_p7), %s495_s10, 9 }
  0x35   : > { %s2416_s16 = scalar_lea.vmem (!%p489_p7), [#allocation2], %s1793_s15  ;;  %p534_p8 = scmp.lt.s32.totalorder (!%p489_p7), %s1794_s7, 31 }
  0x39   : > { %v1816_v0 = vld [vmem:[%s2769_s2 + $0x8] sm:$0xff]  ;;  %v567_v1 = vld [vmem:[%s2769_s2] sm:$0xff]  ;;  %v1865_v2 = vld [vmem:[%s2769_s2 + $0x10] sm:$0xff]  ;;  %vm587_vm0 = vcmask 64512   ;;  %s2777_s7 = smov (!%p534_p8, %s1794_s7), 31  ;;  %vm1467_vm1 = vcmask 261120  }
  0x3a   : > { %2158 = vmatprep.subr.mxu1 %v1816_v0  ;;  %2022 = vmatprep.subr.mxu0 %v1816_v0  ;;  %v1800_v3 = vld [vmem:[%s2416_s16 + $0x80] sm:$0xff]  ;;  %v1801_v5 = vld [vmem:[%s2416_s16 + $0x88] sm:$0xff]  ;;  %v1802_v7 = vld [vmem:[%s2416_s16 + $0x90] sm:$0xff]  ;;  %s2517_s20 = sshll.u32 %s2777_s7, 3  ;;  %vm1430_vm2 = vcmask 523264  }
  0x3b   : > { %2159 = vmatpush3.msra.mxu1 %v1816_v0  ;;  %2023 = vmatpush3.msra.mxu0 %v1816_v0  ;;  %v1808_v4 = vld [vmem:[%s2416_s16 + $0xc0] sm:$0xff]  ;;  %v1809_v6 = vld [vmem:[%s2416_s16 + $0xc8] sm:$0xff]  ;;  %v1810_v8 = vld [vmem:[%s2416_s16 + $0xd0] sm:$0xff]  ;;  %s2529_s9 = scalar_lea.vmem %s2768_s1, %s2517_s20  ;;  %s2659_s12 = scalar_lea.vmem %s2772_s5, %s2517_s20 }
  0x3c   : > { %2048 = vmatprep.subr.mxu1 %v567_v1  ;;  %2074 = vmatprep.subr.mxu0 %v1865_v2  ;;  %v1898_v9 = vld [vmem:[%s2769_s2 + $0x18] sm:$0xff]  ;;  %v1804_v13 = vld [vmem:[%s2416_s16 + $0xa0] sm:$0xff]  ;;  %v1805_v15 = vld [vmem:[%s2416_s16 + $0xa8] sm:$0xff]  ;;  %s2665_s15 = scalar_lea.vmem %s2771_s4, %s2517_s20 }
  0x3d   : > { %2024 = vmatprep.mubr.msk.f32.mxu0 %vm587_vm0, %v1800_v3  ;;  %2036 = vmatprep.mubr.msk.f32.mxu1 %vm587_vm0, %v1808_v4  ;;  %v1466_v10 = vld [vmem:[%s2770_s3 + $0x18] sm:$0xff]  ;;  %v1812_v14 = vld [vmem:[%s2416_s16 + $0xe0] sm:$0xff]  ;;  %v1813_v16 = vld [vmem:[%s2416_s16 + $0xe8] sm:$0xff] }
  0x3e   : > { %2025 = vmatmul.mubr.msk.f32.vlgmr.msra.gmra.mxu0 %vm587_vm0, %v1801_v5  ;;  %2037 = vmatmul.mubr.msk.f32.vlgmr.msra.gmra.mxu1 %vm587_vm0, %v1809_v6  ;;  %v1803_v11 = vld [vmem:[%s2416_s16 + $0x98] sm:$0xff]  ;;  %v1806_v17 = vld [vmem:[%s2416_s16 + $0xb0] sm:$0xff]  ;;  %v551_v21 = vld [vmem:[%s2416_s16] sm:$0xff] }
  0x3f   : > { %2049 = vmatpush3.msra.mxu1 %v567_v1  ;;  %2075 = vmatpush3.msra.mxu0 %v1865_v2  ;;  %v1811_v12 = vld [vmem:[%s2416_s16 + $0xd8] sm:$0xff]  ;;  %v1814_v18 = vld [vmem:[%s2416_s16 + $0xf0] sm:$0xff]  ;;  %v1849_v22 = vld [vmem:[%s2416_s16 + $0x100] sm:$0xff] }
  0x40   : > { %2027 = vmatprep.mubr.msk.f32.mxu0 %vm587_vm0, %v1802_v7  ;;  %2039 = vmatprep.mubr.msk.f32.mxu1 %vm587_vm0, %v1810_v8  ;;  %v1807_v19 = vld [vmem:[%s2416_s16 + $0xb8] sm:$0xff]  ;;  %v552_v23 = vld [vmem:[%s2416_s16 + $0x8] sm:$0xff]  ;;  %v553_v25 = vld [vmem:[%s2416_s16 + $0x10] sm:$0xff] }
  0x41   : > { %2100 = vmatprep.subr.mxu1 %v1898_v9  ;;  %2126 = vmatprep.subr.mxu0 %v1466_v10  ;;  %v1815_v20 = vld [vmem:[%s2416_s16 + $0xf8] sm:$0xff]  ;;  %v1850_v24 = vld [vmem:[%s2416_s16 + $0x108] sm:$0xff]  ;;  %v1851_v26 = vld [vmem:[%s2416_s16 + $0x110] sm:$0xff] }
  0x42   : > { %2028 = vmatmul.mubr.msk.f32.gmra.mxu0 %vm587_vm0, %v1803_v11  ;;  %2040 = vmatmul.mubr.msk.f32.gmra.mxu1 %vm587_vm0, %v1811_v12  ;;  %v1465_v27 = vld [vmem:[%s2770_s3 + $0x10] sm:$0xff]  ;;  %v554_v28 = vld [vmem:[%s2416_s16 + $0x18] sm:$0xff]  ;;  %v555_v30 = vld [vmem:[%s2416_s16 + $0x20] sm:$0xff] }
  0x43   : > { %2030 = vmatprep.mubr.msk.f32.mxu0 %vm587_vm0, %v1804_v13  ;;  %2042 = vmatprep.mubr.msk.f32.mxu1 %vm587_vm0, %v1812_v14  ;;  %v1852_v29 = vld [vmem:[%s2416_s16 + $0x118] sm:$0xff]  ;;  %v1853_v31 = vld [vmem:[%s2416_s16 + $0x120] sm:$0xff]  ;;  %v1464_v32 = vld [vmem:[%s2770_s3 + $0x8] sm:$0xff] }
  0x44   : > { %v556_v33 = vld [vmem:[%s2416_s16 + $0x28] sm:$0xff]  ;;  %v557_v35 = vld [vmem:[%s2416_s16 + $0x30] sm:$0xff]  ;;  %v1463_v37 = vld [vmem:[%s2770_s3] sm:$0xff] }
  0x45   : > { %v1854_v34 = vld [vmem:[%s2416_s16 + $0x128] sm:$0xff]  ;;  %v1855_v36 = vld [vmem:[%s2416_s16 + $0x130] sm:$0xff]  ;;  %v558_v38 = vld [vmem:[%s2416_s16 + $0x38] sm:$0xff] }
  0x46   : > { %2031 = vmatmul.mubr.msk.f32.gmra.mxu0 %vm587_vm0, %v1805_v15  ;;  %2043 = vmatmul.mubr.msk.f32.gmra.mxu1 %vm587_vm0, %v1813_v16  ;;  %v1856_v39 = vld [vmem:[%s2416_s16 + $0x138] sm:$0xff]  ;;  %v559_v40 = vld [vmem:[%s2416_s16 + $0x40] sm:$0xff]  ;;  %v560_v42 = vld [vmem:[%s2416_s16 + $0x48] sm:$0xff] }
  0x47   : > { %2033 = vmatprep.mubr.msk.f32.mxu0 %vm587_vm0, %v1806_v17  ;;  %2045 = vmatprep.mubr.msk.f32.mxu1 %vm587_vm0, %v1814_v18  ;;  %v1857_v41 = vld [vmem:[%s2416_s16 + $0x140] sm:$0xff]  ;;  %v1858_v43 = vld [vmem:[%s2416_s16 + $0x148] sm:$0xff]  ;;  %v561_v44 = vld [vmem:[%s2416_s16 + $0x50] sm:$0xff] }
  0x48   : > { %v1859_v45 = vld [vmem:[%s2416_s16 + $0x150] sm:$0xff]  ;;  %v562_v46 = vld [vmem:[%s2416_s16 + $0x58] sm:$0xff]  ;;  %v563_v48 = vld [vmem:[%s2416_s16 + $0x60] sm:$0xff] }
  0x49   : > { %v1860_v47 = vld [vmem:[%s2416_s16 + $0x158] sm:$0xff]  ;;  %v1861_v49 = vld [vmem:[%s2416_s16 + $0x160] sm:$0xff]  ;;  %v564_v50 = vld [vmem:[%s2416_s16 + $0x68] sm:$0xff] }
  0x4a   : > { %2034 = vmatmul.mubr.msk.f32.gmra.mxu0 %vm587_vm0, %v1807_v19  ;;  %2046 = vmatmul.mubr.msk.f32.gmra.mxu1 %vm587_vm0, %v1815_v20  ;;  %v1862_v51 = vld [vmem:[%s2416_s16 + $0x168] sm:$0xff]  ;;  %v565_v52 = vld [vmem:[%s2416_s16 + $0x70] sm:$0xff]  ;;  %v566_v54 = vld [vmem:[%s2416_s16 + $0x78] sm:$0xff] }
  0x4b   : > { %2050 = vmatprep.mubr.msk.f32.mxu1 %vm587_vm0, %v551_v21  ;;  %2076 = vmatprep.mubr.msk.f32.mxu0 %vm587_vm0, %v1849_v22  ;;  %v1863_v53 = vld [vmem:[%s2416_s16 + $0x170] sm:$0xff]  ;;  %v1864_v55 = vld [vmem:[%s2416_s16 + $0x178] sm:$0xff]  ;;  %v1882_v56 = vld [vmem:[%s2416_s16 + $0x180] sm:$0xff] }
  0x4c   : > { %v1447_v57 = vld [vmem:[%s2529_s9] sm:$0xff]  ;;  %v1883_v58 = vld [vmem:[%s2416_s16 + $0x188] sm:$0xff]  ;;  %v1884_v60 = vld [vmem:[%s2416_s16 + $0x190] sm:$0xff] }
  0x4d   : > { %v1448_v59 = vld [vmem:[%s2529_s9 + $0x8] sm:$0xff]  ;;  %v1449_v61 = vld [vmem:[%s2529_s9 + $0x10] sm:$0xff]  ;;  %v1885_v62 = vld [vmem:[%s2416_s16 + $0x198] sm:$0xff] }
  0x4e   : > { %2051 = vmatmul.mubr.msk.f32.vlgmr.msra.gmra.mxu1 %vm587_vm0, %v552_v23  ;;  %2077 = vmatmul.mubr.msk.f32.vlgmr.msra.gmra.mxu0 %vm587_vm0, %v1850_v24  ;;  %v1450_v63 = vld [vmem:[%s2529_s9 + $0x18] sm:$0xff]  ;;  %v1886_v0 = vld [vmem:[%s2416_s16 + $0x1a0] sm:$0xff]  ;;  %v1887_v2 = vld [vmem:[%s2416_s16 + $0x1a8] sm:$0xff] }
  0x4f   : > { %2101 = vmatpush3.msra.mxu1 %v1898_v9  ;;  %2127 = vmatpush3.msra.mxu0 %v1466_v10  ;;  %v1451_v1 = vld [vmem:[%s2529_s9 + $0x20] sm:$0xff]  ;;  %v1452_v3 = vld [vmem:[%s2529_s9 + $0x28] sm:$0xff]  ;;  %v1888_v4 = vld [vmem:[%s2416_s16 + $0x1b0] sm:$0xff] }
  0x50   : > { %2053 = vmatprep.mubr.msk.f32.mxu1 %vm587_vm0, %v553_v25  ;;  %2079 = vmatprep.mubr.msk.f32.mxu0 %vm587_vm0, %v1851_v26  ;;  %v1453_v5 = vld [vmem:[%s2529_s9 + $0x30] sm:$0xff]  ;;  %v1889_v6 = vld [vmem:[%s2416_s16 + $0x1b8] sm:$0xff]  ;;  %v1890_v8 = vld [vmem:[%s2416_s16 + $0x1c0] sm:$0xff] }
  0x51   : > { %2128 = vmatprep.subr.mxu0 %v1465_v27  ;;  %v1454_v7 = vld [vmem:[%s2529_s9 + $0x38] sm:$0xff]  ;;  %v1455_v9 = vld [vmem:[%s2529_s9 + $0x40] sm:$0xff]  ;;  %v1891_v10 = vld [vmem:[%s2416_s16 + $0x1c8] sm:$0xff] }
  0x52   : > { %2054 = vmatmul.mubr.msk.f32.gmra.mxu1 %vm587_vm0, %v554_v28  ;;  %2080 = vmatmul.mubr.msk.f32.gmra.mxu0 %vm587_vm0, %v1852_v29  ;;  %v1456_v11 = vld [vmem:[%s2529_s9 + $0x48] sm:$0xff]  ;;  %v1892_v12 = vld [vmem:[%s2416_s16 + $0x1d0] sm:$0xff]  ;;  %v1893_v14 = vld [vmem:[%s2416_s16 + $0x1d8] sm:$0xff] }
  0x53   : > { %2056 = vmatprep.mubr.msk.f32.mxu1 %vm587_vm0, %v555_v30  ;;  %2082 = vmatprep.mubr.msk.f32.mxu0 %vm587_vm0, %v1853_v31  ;;  %v1457_v13 = vld [vmem:[%s2529_s9 + $0x50] sm:$0xff]  ;;  %v1458_v15 = vld [vmem:[%s2529_s9 + $0x58] sm:$0xff]  ;;  %v1894_v16 = vld [vmem:[%s2416_s16 + $0x1e0] sm:$0xff] }
  0x54   : > { %2129 = vmatpush3.msra.mxu0 %v1465_v27  ;;  %v1459_v17 = vld [vmem:[%s2529_s9 + $0x60] sm:$0xff]  ;;  %v1895_v18 = vld [vmem:[%s2416_s16 + $0x1e8] sm:$0xff]  ;;  %v1896_v20 = vld [vmem:[%s2416_s16 + $0x1f0] sm:$0xff] }
  0x55   : > { %2130 = vmatprep.subr.mxu0 %v1464_v32  ;;  %v1460_v19 = vld [vmem:[%s2529_s9 + $0x68] sm:$0xff]  ;;  %v1461_v21 = vld [vmem:[%s2529_s9 + $0x70] sm:$0xff]  ;;  %v1897_v22 = vld [vmem:[%s2416_s16 + $0x1f8] sm:$0xff] }
  0x56   : > { %2057 = vmatmul.mubr.msk.f32.gmra.mxu1 %vm587_vm0, %v556_v33  ;;  %2083 = vmatmul.mubr.msk.f32.gmra.mxu0 %vm587_vm0, %v1854_v34  ;;  %v1462_v23 = vld [vmem:[%s2529_s9 + $0x78] sm:$0xff] }
  0x57   : > { %2059 = vmatprep.mubr.msk.f32.mxu1 %vm587_vm0, %v557_v35  ;;  %2085 = vmatprep.mubr.msk.f32.mxu0 %vm587_vm0, %v1855_v36 }
  0x58   : > { %2131 = vmatpush3.msra.mxu0 %v1464_v32 }
  0x59   : > { %2132 = vmatprep.subr.mxu0 %v1463_v37 }
  0x5a   : > { %2060 = vmatmul.mubr.msk.f32.gmra.mxu1 %vm587_vm0, %v558_v38  ;;  %2086 = vmatmul.mubr.msk.f32.gmra.mxu0 %vm587_vm0, %v1856_v39 }
  0x5b   : > { %2062 = vmatprep.mubr.msk.f32.mxu1 %vm587_vm0, %v559_v40  ;;  %2088 = vmatprep.mubr.msk.f32.mxu0 %vm587_vm0, %v1857_v41 }
  0x5c   : > { %2133 = vmatpush3.msra.mxu0 %v1463_v37 }
  0x5e   : > { %2063 = vmatmul.mubr.msk.f32.gmra.mxu1 %vm587_vm0, %v560_v42  ;;  %2089 = vmatmul.mubr.msk.f32.gmra.mxu0 %vm587_vm0, %v1858_v43 }
  0x5f   : > { %2065 = vmatprep.mubr.msk.f32.mxu1 %vm587_vm0, %v561_v44  ;;  %2091 = vmatprep.mubr.msk.f32.mxu0 %vm587_vm0, %v1859_v45 }
  0x62   : > { %2066 = vmatmul.mubr.msk.f32.gmra.mxu1 %vm587_vm0, %v562_v46  ;;  %2092 = vmatmul.mubr.msk.f32.gmra.mxu0 %vm587_vm0, %v1860_v47 }
  0x63   : > { %2068 = vmatprep.mubr.msk.f32.mxu1 %vm587_vm0, %v563_v48  ;;  %2094 = vmatprep.mubr.msk.f32.mxu0 %vm587_vm0, %v1861_v49 }
  0x66   : > { %2069 = vmatmul.mubr.msk.f32.gmra.mxu1 %vm587_vm0, %v564_v50  ;;  %2095 = vmatmul.mubr.msk.f32.gmra.mxu0 %vm587_vm0, %v1862_v51 }
  0x67   : > { %2071 = vmatprep.mubr.msk.f32.mxu1 %vm587_vm0, %v565_v52  ;;  %2097 = vmatprep.mubr.msk.f32.mxu0 %vm587_vm0, %v1863_v53 }
  0x6a   : > { %2072 = vmatmul.mubr.msk.f32.gmra.mxu1 %vm587_vm0, %v566_v54  ;;  %2098 = vmatmul.mubr.msk.f32.gmra.mxu0 %vm587_vm0, %v1864_v55 }
  0x6b   : > { %2102 = vmatprep.mubr.msk.f32.mxu1 %vm587_vm0, %v1882_v56  ;;  %2134 = vmatprep.mubr.msk.f32.mxu0 %vm1467_vm1, %v1447_v57 }
  0x6e   : > { %2103 = vmatmul.mubr.msk.f32.vlgmr.msra.gmra.mxu1 %vm587_vm0, %v1883_v58  ;;  %2135 = vmatmul.mubr.msk.f32.vlgmr.msra.gmra.mxu0 %vm1467_vm1, %v1448_v59 }
  0x6f   : > { %2105 = vmatprep.mubr.msk.f32.mxu1 %vm587_vm0, %v1884_v60  ;;  %2137 = vmatprep.mubr.msk.f32.mxu0 %vm1467_vm1, %v1449_v61 }
  0x72   : > { %2106 = vmatmul.mubr.msk.f32.gmra.mxu1 %vm587_vm0, %v1885_v62  ;;  %2138 = vmatmul.mubr.msk.f32.gmra.mxu0 %vm1467_vm1, %v1450_v63 }
  0x73   : > { %2108 = vmatprep.mubr.msk.f32.mxu1 %vm587_vm0, %v1886_v0  ;;  %2140 = vmatprep.mubr.msk.f32.mxu0 %vm1467_vm1, %v1451_v1 }
  0x76   : > { %2109 = vmatmul.mubr.msk.f32.gmra.mxu1 %vm587_vm0, %v1887_v2  ;;  %2141 = vmatmul.mubr.msk.f32.gmra.mxu0 %vm1467_vm1, %v1452_v3 }
  0x77   : > { %2111 = vmatprep.mubr.msk.f32.mxu1 %vm587_vm0, %v1888_v4  ;;  %2143 = vmatprep.mubr.msk.f32.mxu0 %vm1467_vm1, %v1453_v5 }
  0x7a   : > { %2112 = vmatmul.mubr.msk.f32.gmra.mxu1 %vm587_vm0, %v1889_v6  ;;  %2144 = vmatmul.mubr.msk.f32.gmra.mxu0 %vm1467_vm1, %v1454_v7 }
  0x7b   : > { %2114 = vmatprep.mubr.msk.f32.mxu1 %vm587_vm0, %v1890_v8  ;;  %2146 = vmatprep.mubr.msk.f32.mxu0 %vm1467_vm1, %v1455_v9 }
  0x7e   : > { %2115 = vmatmul.mubr.msk.f32.gmra.mxu1 %vm587_vm0, %v1891_v10  ;;  %2147 = vmatmul.mubr.msk.f32.gmra.mxu0 %vm1467_vm1, %v1456_v11 }
  0x7f   : > { %2117 = vmatprep.mubr.msk.f32.mxu1 %vm587_vm0, %v1892_v12  ;;  %2149 = vmatprep.mubr.msk.f32.mxu0 %vm1467_vm1, %v1457_v13 }
  0x82   : > { %2118 = vmatmul.mubr.msk.f32.gmra.mxu1 %vm587_vm0, %v1893_v14  ;;  %2150 = vmatmul.mubr.msk.f32.gmra.mxu0 %vm1467_vm1, %v1458_v15 }
  0x83   : > { %2120 = vmatprep.mubr.msk.f32.mxu1 %vm587_vm0, %v1894_v16  ;;  %2152 = vmatprep.mubr.msk.f32.mxu0 %vm1467_vm1, %v1459_v17 }
  0x86   : > { %2121 = vmatmul.mubr.msk.f32.gmra.mxu1 %vm587_vm0, %v1895_v18  ;;  %2153 = vmatmul.mubr.msk.f32.gmra.mxu0 %vm1467_vm1, %v1460_v19 }
  0x87   : > { %2123 = vmatprep.mubr.msk.f32.mxu1 %vm587_vm0, %v1896_v20  ;;  %2155 = vmatprep.mubr.msk.f32.mxu0 %vm1467_vm1, %v1461_v21 }
  0x8a   : > { %2124 = vmatmul.mubr.msk.f32.gmra.mxu1 %vm587_vm0, %v1897_v22  ;;  %2156 = vmatmul.mubr.msk.f32.gmra.mxu0 %vm1467_vm1, %v1462_v23 }
  0xfe   : > { %v2026_v24 = vpop.f32.mrf.mxu0  ;;  %v2603_v25 = vpop.f32.mrf.mxu1 }
 0x100   : > { %v702_v26 = vpop.f32.mrf.mxu0  ;;  %v2605_v27 = vpop.f32.mrf.mxu1 }
 0x102   : > { %v2029_v28 = vpop.f32.mrf.mxu0  ;;  %v2607_v29 = vpop.f32.mrf.mxu1 }
 0x104   : > { %v712_v30 = vpop.f32.mrf.mxu0  ;;  %v2609_v31 = vpop.f32.mrf.mxu1 }
 0x106   : > { %v2032_v32 = vpop.f32.mrf.mxu0  ;;  %v2611_v33 = vpop.f32.mrf.mxu1 }
 0x108   : > { %v722_v34 = vpop.f32.mrf.mxu0  ;;  %v2613_v35 = vpop.f32.mrf.mxu1 }
 0x10a   : > { %v2615_v36 = vpop.f32.mrf.mxu0  ;;  %v2617_v37 = vpop.f32.mrf.mxu1 }
 0x10c   : > { %v2619_v38 = vpop.f32.mrf.mxu0  ;;  %v2621_v39 = vpop.f32.mrf.mxu1 }
 0x10e   : > { %v2052_v40 = vpop.f32.mrf.mxu1  ;;  %v2078_v41 = vpop.f32.mrf.mxu0 }
 0x10f   : > { %v901_v4 = vadd.f32 %v2052_v40, %v2026_v24 }
 0x110   : > { %v895_v42 = vpop.f32.mrf.mxu1  ;;  %v1107_v43 = vpop.f32.mrf.mxu0 }
 0x111   : > { %v896_v7 = vadd.f32 %v895_v42, %v702_v26  ;;  %v1187_v10 = vadd.f32 %v2078_v41, %v901_v4 }
 0x112   : > { %v2055_v44 = vpop.f32.mrf.mxu1  ;;  %v2081_v45 = vpop.f32.mrf.mxu0 }
 0x113   : > { %v911_v11 = vadd.f32 %v2055_v44, %v2029_v28  ;;  %v1186_v14 = vadd.f32 %v1107_v43, %v896_v7 }
 0x114   : > { %v905_v46 = vpop.f32.mrf.mxu1  ;;  %v1117_v47 = vpop.f32.mrf.mxu0 }
 0x115   : > { %v906_v15 = vadd.f32 %v905_v46, %v712_v30  ;;  %v1189_v19 = vadd.f32 %v2081_v45, %v911_v11 }
 0x116   : > { %v2058_v48 = vpop.f32.mrf.mxu1  ;;  %v2084_v49 = vpop.f32.mrf.mxu0 }
 0x117   : > { %v921_v20 = vadd.f32 %v2058_v48, %v2032_v32  ;;  %v1188_v24 = vadd.f32 %v1117_v47, %v906_v15 }
 0x118   : > { %v915_v50 = vpop.f32.mrf.mxu1  ;;  %v1127_v51 = vpop.f32.mrf.mxu0 }
 0x119   : > { %v916_v26 = vadd.f32 %v915_v50, %v722_v34  ;;  %v1191_v32 = vadd.f32 %v2084_v49, %v921_v20 }
 0x11a   : > { %v2061_v52 = vpop.f32.mrf.mxu1  ;;  %v2087_v53 = vpop.f32.mrf.mxu0 }
 0x11b   : > { %v931_v41 = vadd.f32 %v2061_v52, %v2615_v36  ;;  %v1190_v44 = vadd.f32 %v1127_v51, %v916_v26 }
 0x11c   : > { %v925_v54 = vpop.f32.mrf.mxu1  ;;  %v2623_v55 = vpop.f32.mrf.mxu0 }
 0x11d   : > { %v926_v45 = vadd.f32 %v925_v54, %v2619_v38  ;;  %v1193_v48 = vadd.f32 %v2087_v53, %v931_v41 }
 0x11e   : > { %v2064_v56 = vpop.f32.mrf.mxu1  ;;  %v2625_v57 = vpop.f32.mrf.mxu0 }
 0x11f   : > { %v941_v49 = vadd.f32 %v2064_v56, %v2603_v25  ;;  %v1192_v52 = vadd.f32 %v2623_v55, %v926_v45 }
 0x120   : > { %v2627_v58 = vpop.f32.mrf.mxu1  ;;  %v2629_v59 = vpop.f32.mrf.mxu0 }
 0x121   : > { %v936_v54 = vadd.f32 %v2627_v58, %v2605_v27  ;;  %v1195_v4 = vadd.f32 %v2625_v57, %v941_v49 }
 0x122   : > { %v2631_v60 = vpop.f32.mrf.mxu1  ;;  %v2633_v61 = vpop.f32.mrf.mxu0 }
 0x123   : > { %v951_v7 = vadd.f32 %v2631_v60, %v2607_v29 }
 0x124   : > { %v2635_v62 = vpop.f32.mrf.mxu1  ;;  %v2637_v63 = vpop.f32.mrf.mxu0 }
 0x125   : > { %v946_v11 = vadd.f32 %v2635_v62, %v2609_v31 }
 0x126   : > { %v2639_v0 = vpop.f32.mrf.mxu1  ;;  %v2641_v1 = vpop.f32.mrf.mxu0 }
 0x128   : > { %v2643_v2 = vpop.f32.mrf.mxu1  ;;  %v2645_v3 = vpop.f32.mrf.mxu0 }
 0x129   : > { %v956_v15 = vadd.f32 %v2643_v2, %v2613_v35 }
 0x12a   : > { %v2647_v5 = vpop.f32.mrf.mxu1  ;;  %v2649_v6 = vpop.f32.mrf.mxu0 }
 0x12c   : > { %v2651_v8 = vpop.f32.mrf.mxu1  ;;  %v2653_v9 = vpop.f32.mrf.mxu0 }
 0x12e   : > { %v2104_v12 = vpop.f32.mrf.mxu1  ;;  %v2136_v13 = vpop.f32.mrf.mxu0 }
 0x12f   : > { %v1415_v16 = vadd.f32 %v2104_v12, %v1187_v10  ;;  %1662 = vst.msk [vmem:[%s2659_s12 + $0x8] sm:$0xff] %vm1467_vm1, %v2136_v13  ;;  %v1194_v10 = vadd.f32 %v2629_v59, %v936_v54  ;;  %v1197_v12 = vadd.f32 %v2633_v61, %v951_v7  ;;  %v961_v13 = vadd.f32 %v2639_v0, %v2611_v33 }
 0x130   : > { %v1335_v17 = vpop.f32.mrf.mxu1  ;;  %v1582_v18 = vpop.f32.mrf.mxu0 }
 0x131   : > { %1432 = vst.msk [vmem:[%s2665_s15 + $0x8] sm:$0xff] %vm1430_vm2, %v1415_v16  ;;  %v1414_v21 = vadd.f32 %v1335_v17, %v1186_v14  ;;  %v1196_v14 = vadd.f32 %v2637_v63, %v946_v11  ;;  %v1199_v16 = vadd.f32 %v2641_v1, %v961_v13  ;;  %v971_v17 = vadd.f32 %v2647_v5, %v2617_v37 }
 0x132   : > { %1661 = vst.msk [vmem:[%s2659_s12] sm:$0xff] %vm1467_vm1, %v1582_v18  ;;  %v2107_v22 = vpop.f32.mrf.mxu1  ;;  %v2139_v23 = vpop.f32.mrf.mxu0  ;;  %v1198_v18 = vadd.f32 %v2645_v3, %v956_v15 }
 0x133   : > { %1431 = vst.msk [vmem:[%s2665_s15] sm:$0xff] %vm1430_vm2, %v1414_v21  ;;  %v1417_v28 = vadd.f32 %v2107_v22, %v1189_v19  ;;  %v966_v19 = vadd.f32 %v2651_v8, %v2621_v39  ;;  %v1201_v20 = vadd.f32 %v2649_v6, %v971_v17 }
 0x134   : > { %1664 = vst.msk [vmem:[%s2659_s12 + $0x18] sm:$0xff] %vm1467_vm1, %v2139_v23  ;;  %v1345_v30 = vpop.f32.mrf.mxu1  ;;  %v1592_v40 = vpop.f32.mrf.mxu0 }
 0x135   : > { %1434 = vst.msk [vmem:[%s2665_s15 + $0x18] sm:$0xff] %vm1430_vm2, %v1417_v28  ;;  %v1416_v42 = vadd.f32 %v1345_v30, %v1188_v24  ;;  %v1200_v39 = vadd.f32 %v2653_v9, %v966_v19 }
 0x136   : > { %1663 = vst.msk [vmem:[%s2659_s12 + $0x10] sm:$0xff] %vm1467_vm1, %v1592_v40  ;;  %v2110_v43 = vpop.f32.mrf.mxu1  ;;  %v2142_v34 = vpop.f32.mrf.mxu0 }
 0x137   : > { %1433 = vst.msk [vmem:[%s2665_s15 + $0x10] sm:$0xff] %vm1430_vm2, %v1416_v42  ;;  %v1419_v46 = vadd.f32 %v2110_v43, %v1191_v32 }
 0x138   : > { %1666 = vst.msk [vmem:[%s2659_s12 + $0x28] sm:$0xff] %vm1467_vm1, %v2142_v34  ;;  %v1355_v47 = vpop.f32.mrf.mxu1  ;;  %v1602_v36 = vpop.f32.mrf.mxu0 }
 0x139   : > { %1436 = vst.msk [vmem:[%s2665_s15 + $0x28] sm:$0xff] %vm1430_vm2, %v1419_v46  ;;  %v1418_v50 = vadd.f32 %v1355_v47, %v1190_v44 }
 0x13a   : > { %1665 = vst.msk [vmem:[%s2659_s12 + $0x20] sm:$0xff] %vm1467_vm1, %v1602_v36  ;;  %v2113_v51 = vpop.f32.mrf.mxu1  ;;  %v2145_v38 = vpop.f32.mrf.mxu0 }
 0x13b   : > { %1435 = vst.msk [vmem:[%s2665_s15 + $0x20] sm:$0xff] %vm1430_vm2, %v1418_v50  ;;  %v1421_v53 = vadd.f32 %v2113_v51, %v1193_v48 }
 0x13c   : > { %1668 = vst.msk [vmem:[%s2659_s12 + $0x38] sm:$0xff] %vm1467_vm1, %v2145_v38  ;;  %v1365_v25 = vpop.f32.mrf.mxu1  ;;  %v1612_v56 = vpop.f32.mrf.mxu0 }
 0x13d   : > { %1438 = vst.msk [vmem:[%s2665_s15 + $0x38] sm:$0xff] %vm1430_vm2, %v1421_v53  ;;  %v1420_v55 = vadd.f32 %v1365_v25, %v1192_v52 }
 0x13e   : > { %1667 = vst.msk [vmem:[%s2659_s12 + $0x30] sm:$0xff] %vm1467_vm1, %v1612_v56  ;;  %v2116_v27 = vpop.f32.mrf.mxu1  ;;  %v2148_v58 = vpop.f32.mrf.mxu0 }
 0x13f   : > { %1437 = vst.msk [vmem:[%s2665_s15 + $0x30] sm:$0xff] %vm1430_vm2, %v1420_v55  ;;  %v1423_v57 = vadd.f32 %v2116_v27, %v1195_v4 }
 0x140   : > { %1670 = vst.msk [vmem:[%s2659_s12 + $0x48] sm:$0xff] %vm1467_vm1, %v2148_v58  ;;  %v1375_v29 = vpop.f32.mrf.mxu1  ;;  %v1622_v60 = vpop.f32.mrf.mxu0 }
 0x141   : > { %1440 = vst.msk [vmem:[%s2665_s15 + $0x48] sm:$0xff] %vm1430_vm2, %v1423_v57  ;;  %v1422_v59 = vadd.f32 %v1375_v29, %v1194_v10 }
 0x142   : > { %1669 = vst.msk [vmem:[%s2659_s12 + $0x40] sm:$0xff] %vm1467_vm1, %v1622_v60  ;;  %v2119_v31 = vpop.f32.mrf.mxu1  ;;  %v2151_v62 = vpop.f32.mrf.mxu0 }
 0x143   : > { %1439 = vst.msk [vmem:[%s2665_s15 + $0x40] sm:$0xff] %vm1430_vm2, %v1422_v59  ;;  %v1425_v61 = vadd.f32 %v2119_v31, %v1197_v12 }
 0x144   : > { %1672 = vst.msk [vmem:[%s2659_s12 + $0x58] sm:$0xff] %vm1467_vm1, %v2151_v62  ;;  %v1385_v33 = vpop.f32.mrf.mxu1  ;;  %v1632_v0 = vpop.f32.mrf.mxu0 }
 0x145   : > { %1442 = vst.msk [vmem:[%s2665_s15 + $0x58] sm:$0xff] %vm1430_vm2, %v1425_v61  ;;  %v1424_v63 = vadd.f32 %v1385_v33, %v1196_v14 }
 0x146   : > { %1671 = vst.msk [vmem:[%s2659_s12 + $0x50] sm:$0xff] %vm1467_vm1, %v1632_v0  ;;  %v2122_v35 = vpop.f32.mrf.mxu1  ;;  %v2154_v2 = vpop.f32.mrf.mxu0 }
 0x147   : > { %1441 = vst.msk [vmem:[%s2665_s15 + $0x50] sm:$0xff] %vm1430_vm2, %v1424_v63  ;;  %v1427_v1 = vadd.f32 %v2122_v35, %v1199_v16 }
 0x148   : > { %1674 = vst.msk [vmem:[%s2659_s12 + $0x68] sm:$0xff] %vm1467_vm1, %v2154_v2  ;;  %v1395_v37 = vpop.f32.mrf.mxu1  ;;  %v1642_v5 = vpop.f32.mrf.mxu0 }
 0x149   : > { %1444 = vst.msk [vmem:[%s2665_s15 + $0x68] sm:$0xff] %vm1430_vm2, %v1427_v1  ;;  %v1426_v21 = vadd.f32 %v1395_v37, %v1198_v18 }
 0x14a   : > { %1673 = vst.msk [vmem:[%s2659_s12 + $0x60] sm:$0xff] %vm1467_vm1, %v1642_v5  ;;  %v2125_v3 = vpop.f32.mrf.mxu1  ;;  %v2157_v22 = vpop.f32.mrf.mxu0 }
 0x14b   : > { %1443 = vst.msk [vmem:[%s2665_s15 + $0x60] sm:$0xff] %vm1430_vm2, %v1426_v21  ;;  %v1429_v8 = vadd.f32 %v2125_v3, %v1201_v20 }
 0x14c   : > { %1676 = vst.msk [vmem:[%s2659_s12 + $0x78] sm:$0xff] %vm1467_vm1, %v2157_v22  ;;  %v1405_v23 = vpop.f32.mrf.mxu1  ;;  %v1652_v24 = vpop.f32.mrf.mxu0 }
 0x14d   : > { %1446 = vst.msk [vmem:[%s2665_s15 + $0x78] sm:$0xff] %vm1430_vm2, %v1429_v8  ;;  %v1428_v26 = vadd.f32 %v1405_v23, %v1200_v39 }
 0x14e   : > { %1675 = vst.msk [vmem:[%s2659_s12 + $0x70] sm:$0xff] %vm1467_vm1, %v1652_v24 }
 0x14f   : > { %1445 = vst.msk [vmem:[%s2665_s15 + $0x70] sm:$0xff] %vm1430_vm2, %v1428_v26 }
 0x150 PF: > { %p13_p9 = scmp.ge.s32.totalorder %s2255_s22, 4   ;;  %s2773_s18 = smov %s2202_s19 }
 0x151   : > { %s2774_s19 = smov %s2264_s25  ;;  %s2775_s20 = smov %s2255_s22 }
 0x152   :  { %15 = sbr.rel (!%p13_p9) target bundleno = 2 (0x2), region = 130 }

</bundles_post_ra>
